<compile_context>
chip_gen: v5e
topology: v5e:2x2
jax: 0.10.0
libtpu: 0.0.40
codegen_flags: <defaults>
</compile_context>

<pallas_src>
import functools
import math

import jax
import jax.numpy as jnp
from jax import lax
from jax.experimental import pallas as pl
from jax.experimental.pallas import tpu as pltpu

TABLE_PAD = 128  # combined table rows padded to 128 == lane width / MXU K dim
LANE = 128


def _round_up(x, m):
    return (x + m - 1) // m * m


def _fixed_embedding_table(c_in, d_model):
    """Reproduces FixedEmbedding.__init__ weight construction."""
    position = jnp.arange(c_in, dtype=jnp.float32)[:, None]
    div_term = jnp.exp(
        jnp.arange(0, d_model, 2, dtype=jnp.float32) * -(math.log(10000.0) / d_model)
    )
    w = jnp.zeros((c_in, d_model), dtype=jnp.float32)
    w = w.at[:, 0::2].set(jnp.sin(position * div_term))
    w = w.at[:, 1::2].set(jnp.cos(position * div_term))
    return w


def temporal_embedding_kernel(x_ref, table_ref, o_ref, *, offsets):
    # x_ref:     [TN, F]         int32 calendar indices for this row tile
    # table_ref: [TABLE_PAD, D]  f32 combined (hour|weekday|day|month[|minute]) table
    # o_ref:     [TN, D]         f32 summed temporal embedding
    tn = x_ref.shape[0]
    col = lax.broadcasted_iota(jnp.int32, (tn, TABLE_PAD), 1)  # lane iota
    hot = None
    for f, off in enumerate(offsets):
        idx = x_ref[:, f : f + 1] + off          # [TN, 1]; broadcast across lanes
        m = col == idx
        # per-feature row ranges in the combined table are disjoint -> OR == add
        hot = m if hot is None else jnp.logical_or(hot, m)
    multihot = hot.astype(table_ref.dtype)       # [TN, TABLE_PAD], exact 0/1
    # Canonical MXU matmul: K on LHS lanes / RHS sublanes -> no hidden transpose.
    o_ref[...] = jnp.dot(multihot, table_ref[...], preferred_element_type=jnp.float32)


def make_temporal_embedding(d_model, freq="h", tile_n=512):
    """Builds deterministic fixed tables and returns (forward, reference)."""
    # combined table layout (row offsets):
    table_order = [("hour", 24), ("weekday", 7), ("day", 32), ("month", 13)]
    if freq == "t":
        table_order.append(("minute", 4))

    parts, offsets_by_name, off = [], {}, 0
    for name, size in table_order:
        offsets_by_name[name] = off
        parts.append(_fixed_embedding_table(size, d_model))
        off += size
    combined = jnp.concatenate(parts, axis=0)
    assert combined.shape[0] <= TABLE_PAD
    combined_p = jnp.pad(combined, ((0, TABLE_PAD - combined.shape[0]), (0, 0)))

    # x feature columns -> offsets into combined table
    col_names = ["month", "day", "weekday", "hour"] + (["minute"] if freq == "t" else [])
    offsets = tuple(offsets_by_name[n] for n in col_names)
    n_feat = len(col_names)

    kernel = functools.partial(temporal_embedding_kernel, offsets=offsets)

    # lane-padded per-row VMEM footprint (used only for budgeting, not shapes)
    d_lane = _round_up(d_model, LANE)

    def _choose_tile_rows(N):
        # double-buffered input (lane-padded int32) + output + multihot temps
        per_row = 4 * (2 * LANE + 2 * d_lane + 2 * TABLE_PAD)
        budget = (24 << 20) - 2 * TABLE_PAD * d_lane * 4      # resident table
        cap = max(8, (budget // per_row) // 8 * 8)
        tn = min(_round_up(tile_n, 8), _round_up(N, 8), cap)
        return max(8, (tn // 8) * 8)

    def forward(x):
        B, L, F = x.shape
        assert F >= n_feat
        N = B * L

        tn = _choose_tile_rows(N)
        Np = _round_up(N, tn)

        x2 = x[..., :n_feat].reshape(N, n_feat).astype(jnp.int32)
        if Np != N:
            # pad rows with index 0: valid lookups, rows are sliced off below
            x2 = jnp.pad(x2, ((0, Np - N), (0, 0)))

        # Explicit VMEM budget (lane-padded tile footprints), portable across
        # v5e (16 MiB default scoped) / v6e (32 MiB) / v7x (64 MiB physical).
        vmem_bytes = (
            2 * tn * LANE * 4            # input block [tn, F] int32 (lane-padded), x2 bufs
            + 2 * tn * d_lane * 4        # output block, x2 bufs
            + 2 * TABLE_PAD * d_lane * 4 # resident combined table (conservative x2)
            + 2 * tn * TABLE_PAD * 4     # multi-hot / mask temporaries
        )
        vmem_limit = int(min(max(vmem_bytes + (2 << 20), 16 << 20), 64 << 20))

        out = pl.pallas_call(
            kernel,
            out_shape=jax.ShapeDtypeStruct((Np, d_model), jnp.float32),
            grid_spec=pltpu.PrefetchScalarGridSpec(
                num_scalar_prefetch=0,
                grid=(Np // tn,),
                in_specs=[
                    pl.BlockSpec((tn, n_feat), lambda i: (i, 0)),
                    # constant block index -> table DMA'd once, stays resident
                    pl.BlockSpec((TABLE_PAD, d_model), lambda i: (0, 0)),
                ],
                out_specs=pl.BlockSpec((tn, d_model), lambda i: (i, 0)),
            ),
            compiler_params=pltpu.CompilerParams(
                dimension_semantics=("parallel",),
                vmem_limit_bytes=vmem_limit,
            ),
        )(x2, combined_p)

        if Np != N:
            out = out[:N]
        return out.reshape(B, L, d_model)

    def reference(x):
        # pure-JAX reference (matches the PyTorch forward for embed_type='fixed')
        x = x.astype(jnp.int32)
        sizes = dict(table_order)
        res = 0.0
        for col_i, name in enumerate(col_names):
            start = offsets_by_name[name]
            tbl = combined[start : start + sizes[name]]
            res = res + jnp.take(tbl, x[:, :, col_i], axis=0)
        return res

    return forward, reference


if __name__ == "__main__":
    d_model = 32
    B, L = 2, 8
    freq = "h"  # 'h' -> 4 calendar features (month, day, weekday, hour)

    key = jax.random.PRNGKey(0)
    km, kd, kw, kh = jax.random.split(key, 4)
    month = jax.random.randint(km, (B, L), 0, 13)
    day = jax.random.randint(kd, (B, L), 0, 32)
    weekday = jax.random.randint(kw, (B, L), 0, 7)
    hour = jax.random.randint(kh, (B, L), 0, 24)
    x = jnp.stack([month, day, weekday, hour], axis=-1).astype(jnp.int32)  # [B, L, 4]

    forward, reference = make_temporal_embedding(d_model, freq=freq)

    out = forward(x)
    jax.block_until_ready(out)

    ref = reference(x)
    assert out.shape == (B, L, d_model)
    assert jnp.max(jnp.abs(out - ref)) < 1e-5, "Pallas kernel mismatch vs reference"

    print("KERNEL_OK")
</pallas_src>

<mosaic_0001>
module attributes {stable_mosaic.version = 11 : i64} {
  func.func @temporal_embedding_kernel(%arg0: i32, %arg1: memref<16x4xi32, #tpu.memory_space<vmem>>, %arg2: memref<128x32xf32, #tpu.memory_space<vmem>>, %arg3: memref<16x32xf32, #tpu.memory_space<vmem>>) attributes {dimension_semantics = [#tpu.dimension_semantics<parallel>], iteration_bounds = array<i64: 1>, scalar_prefetch = 0 : i64, scratch_operands = 0 : i64, tpu.core_type = #tpu.core_type<tc>, window_params = [{transform_indices = @transform_0, window_bounds = array<i64: 16, 4>}, {pipeline_mode = #tpu.pipeline_mode<synchronous>, transform_indices = @transform_1, window_bounds = array<i64: 128, 32>}, {transform_indices = @transform_2, window_bounds = array<i64: 16, 32>}]} {
    %0 = tpu.iota {dimensions = array<i32: 1>} : vector<16x128xi32>
    %c0 = arith.constant 0 : index
    %c0_0 = arith.constant 0 : index
    %1 = vector.load %arg1[%c0, %c0_0] : memref<16x4xi32, #tpu.memory_space<vmem>>, vector<16x1xi32>
    %c63_i32 = arith.constant 63 : i32
    %2 = vector.broadcast %c63_i32 : i32 to vector<16x1xi32>
    %3 = arith.addi %1, %2 : vector<16x1xi32>
    %4 = vector.broadcast %3 : vector<16x1xi32> to vector<16x128xi32>
    %5 = arith.cmpi eq, %0, %4 : vector<16x128xi32>
    %c0_1 = arith.constant 0 : index
    %c1 = arith.constant 1 : index
    %6 = vector.load %arg1[%c0_1, %c1] : memref<16x4xi32, #tpu.memory_space<vmem>>, vector<16x1xi32>
    %c31_i32 = arith.constant 31 : i32
    %7 = vector.broadcast %c31_i32 : i32 to vector<16x1xi32>
    %8 = arith.addi %6, %7 : vector<16x1xi32>
    %9 = vector.broadcast %8 : vector<16x1xi32> to vector<16x128xi32>
    %10 = arith.cmpi eq, %0, %9 : vector<16x128xi32>
    %11 = arith.ori %5, %10 : vector<16x128xi1>
    %c0_2 = arith.constant 0 : index
    %c2 = arith.constant 2 : index
    %12 = vector.load %arg1[%c0_2, %c2] : memref<16x4xi32, #tpu.memory_space<vmem>>, vector<16x1xi32>
    %c24_i32 = arith.constant 24 : i32
    %13 = vector.broadcast %c24_i32 : i32 to vector<16x1xi32>
    %14 = arith.addi %12, %13 : vector<16x1xi32>
    %15 = vector.broadcast %14 : vector<16x1xi32> to vector<16x128xi32>
    %16 = arith.cmpi eq, %0, %15 : vector<16x128xi32>
    %17 = arith.ori %11, %16 : vector<16x128xi1>
    %c0_3 = arith.constant 0 : index
    %c3 = arith.constant 3 : index
    %18 = vector.load %arg1[%c0_3, %c3] : memref<16x4xi32, #tpu.memory_space<vmem>>, vector<16x1xi32>
    %c0_i32 = arith.constant 0 : i32
    %19 = vector.broadcast %c0_i32 : i32 to vector<16x1xi32>
    %20 = arith.addi %18, %19 : vector<16x1xi32>
    %21 = vector.broadcast %20 : vector<16x1xi32> to vector<16x128xi32>
    %22 = arith.cmpi eq, %0, %21 : vector<16x128xi32>
    %23 = arith.ori %17, %22 : vector<16x128xi1>
    %24 = arith.extui %23 : vector<16x128xi1> to vector<16x128xi32>
    %25 = arith.sitofp %24 : vector<16x128xi32> to vector<16x128xf32>
    %c0_4 = arith.constant 0 : index
    %c0_5 = arith.constant 0 : index
    %26 = vector.load %arg2[%c0_4, %c0_5] : memref<128x32xf32, #tpu.memory_space<vmem>>, vector<128x32xf32>
    %cst = arith.constant dense<0.000000e+00> : vector<16x32xf32>
    %27 = tpu.matmul %25, %26, %cst {dimension_numbers = #tpu.dot_dimension_numbers<[1], [0], [0], [1], [0, 0, 1, 1], [], []>} : vector<16x128xf32>, vector<128x32xf32>, vector<16x32xf32> -> vector<16x32xf32>
    %c0_6 = arith.constant 0 : index
    %c0_7 = arith.constant 0 : index
    %28 = vector.load %arg3[%c0_6, %c0_7] : memref<16x32xf32, #tpu.memory_space<vmem>>, vector<16x32xf32>
    tpu.vector_store %arg3[%c0_6, %c0_7], %27 {strides = array<i32>} : memref<16x32xf32, #tpu.memory_space<vmem>>, vector<16x32xf32>,
    return
  }
  func.func @transform_0(%arg0: i32) -> (i32, i32) {
    %c0_i32 = arith.constant 0 : i32
    %c0_i32_0 = arith.constant 0 : i32
    return %arg0, %c0_i32 : i32, i32
  }
  func.func @transform_1(%arg0: i32) -> (i32, i32) {
    %c0_i32 = arith.constant 0 : i32
    %c0_i32_0 = arith.constant 0 : i32
    %c0_i32_1 = arith.constant 0 : i32
    return %c0_i32, %c0_i32_0 : i32, i32
  }
  func.func @transform_2(%arg0: i32) -> (i32, i32) {
    %c0_i32 = arith.constant 0 : i32
    %c0_i32_0 = arith.constant 0 : i32
    return %arg0, %c0_i32 : i32, i32
  }
}

</mosaic_0001>

<bundles_post_ra>
// kernel: tpu_custom_call.1
= control target key start
LH: loop header
LB: loop body
LE: loop exit
PB: predicated region body
PF: predicated region fallthrough
CT: control target
= control target key end

     0   :  { %v183_v1 = vmov 1   ;;  %v184_v2 = vmov 0   ;;  %v185_v6 = vmov 2   ;;  %s263_s0 = inlined_call_operand.vmem [shape: s32[16,4], index: 0, kind: input, shape index: {}]   ;;  %s264_s1 = inlined_call_operand.vmem [shape: f32[128,32], index: 1, kind: input, shape index: {}]   ;;  %s265_s2 = inlined_call_operand.hbm [shape: f32[16,32], index: 2, kind: output, shape index: {}]  }
   0x1   :  { %v14_v0 = vld [vmem:[%s263_s0] sm:$0xff]  ;;  %153 = vset.pattern.permute.xlu1 %v183_v1  ;;  %152 = vset.pattern.permute.xlu0 %v184_v2  ;;  %v79_v5 = vld [vmem:[%s264_s1 + $0x78] sm:$0xff]  ;;  %v78_v8 = vld [vmem:[%s264_s1 + $0x70] sm:$0xff] }
   0x2   :  { %v26_v3 = vadd.s32 31, %v14_v0  ;;  %v16_v4 = vadd.s32 63, %v14_v0  ;;  %154 = vset.pattern.permute.xlu2 %v185_v6  ;;  %v38_v7 = vadd.s32 24, %v14_v0  ;;  %80 = vmatpush.msra.mxu0 %v79_v5 }
   0x4   :  { %29 = vperm.xlu1 %153, %v26_v3   ;;  %19 = vperm.xlu0 %152, %v16_v4  }
   0x5   :  { %7 = vsyncpa [#allocation3], 0  ;;  %v15_v9 = vld [vmem:[%s263_s0 + $0x8] sm:$0xff]  ;;  %41 = vperm.xlu2 %154, %v38_v7   ;;  %128 = vmatpush.msra.mxu1 %v79_v5  ;;  %v76_v11 = vld [vmem:[%s264_s1 + $0x60] sm:$0xff]  ;;  %v186_v17 = vmov 3   ;;  %v12_v31 = vlaneseq  ;;  %v187_v38 = vmov 1.0  }
   0x6   :  { %v77_v10 = vld [vmem:[%s264_s1 + $0x68] sm:$0xff]  ;;  %81 = vmatpush.msra.mxu0 %v78_v8  ;;  %v27_v12 = vadd.s32 31, %v15_v9  ;;  %v17_v13 = vadd.s32 63, %v15_v9  ;;  %v39_v14 = vadd.s32 24, %v15_v9  ;;  %v75_v15 = vld [vmem:[%s264_s1 + $0x58] sm:$0xff]  ;;  %v74_v16 = vld [vmem:[%s264_s1 + $0x50] sm:$0xff] }
   0x7   :  { %129 = vmatpush.msra.mxu1 %v78_v8  ;;  %v73_v18 = vld [vmem:[%s264_s1 + $0x48] sm:$0xff]  ;;  %v72_v19 = vld [vmem:[%s264_s1 + $0x40] sm:$0xff]  ;;  %v71_v20 = vld [vmem:[%s264_s1 + $0x38] sm:$0xff]  ;;  %v13_v32 = vand.u32 127, %v12_v31  ;;  %s112_s19 = sshll.u32 %s265_s2, 4  ;;  %vm103_vm14 = vcmask 261120   ;;  %s113_s19 = int_to_ptr.hbm [resolvable:$true] %s112_s19 }
   0x8   :  { %82 = vmatpush.msra.mxu0 %v77_v10  ;;  %v70_v21 = vld [vmem:[%s264_s1 + $0x30] sm:$0xff]  ;;  %v69_v22 = vld [vmem:[%s264_s1 + $0x28] sm:$0xff]  ;;  %v68_v23 = vld [vmem:[%s264_s1 + $0x20] sm:$0xff]  ;;  %s189_s20 = smov 128   ;;  %s190_s21 = smov 8  }
   0x9   :  { %130 = vmatpush.msra.mxu1 %v77_v10  ;;  %v67_v24 = vld [vmem:[%s264_s1 + $0x18] sm:$0xff]  ;;  %v66_v25 = vld [vmem:[%s264_s1 + $0x10] sm:$0xff]  ;;  %v65_v26 = vld [vmem:[%s264_s1 + $0x8] sm:$0xff] }
   0xa   :  { %83 = vmatpush.msra.mxu0 %v76_v11  ;;  %v64_v27 = vld [vmem:[%s264_s1] sm:$0xff]  ;;  %s188_s1 = smov [#allocation2]  }
   0xb   :  { %131 = vmatpush.msra.mxu1 %v76_v11  ;;  %s110_s16 = sshll.u32 %s188_s1, 4  ;;  %s111_s16 = int_to_ptr.vmem [resolvable:$true] %s110_s16 }
   0xc   :  { %32 = vperm.xlu1 %153, %v27_v12   ;;  %22 = vperm.xlu0 %152, %v17_v13  }
   0xd   :  { %44 = vperm.xlu2 %154, %v39_v14   ;;  %84 = vmatpush.msra.mxu0 %v75_v15 }
   0xe   :  { %132 = vmatpush.msra.mxu1 %v75_v15 }
   0xf   :  { %85 = vmatpush.msra.mxu0 %v74_v16 }
  0x10   :  { %133 = vmatpush.msra.mxu1 %v74_v16 }
  0x11   :  { %86 = vmatpush.msra.mxu0 %v73_v18 }
  0x12   :  { %134 = vmatpush.msra.mxu1 %v73_v18 }
  0x13   :  { %87 = vmatpush.msra.mxu0 %v72_v19 }
  0x14   :  { %156 = vset.pattern.permute.xlu1 %v186_v17  ;;  %155 = vset.pattern.permute.xlu0 %v186_v17 }
  0x15   :  { %54 = vperm.xlu1 %156, %v15_v9   ;;  %51 = vperm.xlu0 %155, %v14_v0  }
  0x16   :  { %135 = vmatpush.msra.mxu1 %v72_v19  ;;  %88 = vmatpush.msra.mxu0 %v71_v20 }
  0x18   :  { %136 = vmatpush.msra.mxu1 %v71_v20  ;;  %89 = vmatpush.msra.mxu0 %v70_v21 }
  0x1a   :  { %137 = vmatpush.msra.mxu1 %v70_v21  ;;  %90 = vmatpush.msra.mxu0 %v69_v22 }
  0x1c   :  { %138 = vmatpush.msra.mxu1 %v69_v22  ;;  %91 = vmatpush.msra.mxu0 %v68_v23 }
  0x1e   :  { %139 = vmatpush.msra.mxu1 %v68_v23  ;;  %92 = vmatpush.msra.mxu0 %v67_v24 }
  0x20   :  { %140 = vmatpush.msra.mxu1 %v67_v24  ;;  %93 = vmatpush.msra.mxu0 %v66_v25 }
  0x22   :  { %141 = vmatpush.msra.mxu1 %v66_v25  ;;  %94 = vmatpush.msra.mxu0 %v65_v26 }
  0x24   :  { %142 = vmatpush.msra.mxu1 %v65_v26  ;;  %95 = vmatpush.msra.mxu0 %v64_v27 }
  0x26   :  { %143 = vmatpush.msra.mxu1 %v64_v27 }
  0x5f   :  { %v42_v30 = vpop.permute.xlu2 %41 }
  0x60   :  { %vm46_vm4 = vcmp.eq.s32.totalorder %v13_v32, %v42_v30 }
  0x67   :  { %v45_v35 = vpop.permute.xlu2 %44 }
  0x68   :  { %vm47_vm6 = vcmp.eq.s32.totalorder %v13_v32, %v45_v35 }
  0x76   :  { %v30_v28 = vpop.permute.xlu1 %29  ;;  %v20_v29 = vpop.permute.xlu0 %19 }
  0x77   :  { %vm34_vm0 = vcmp.eq.s32.totalorder %v13_v32, %v30_v28  ;;  %vm24_vm1 = vcmp.eq.s32.totalorder %v13_v32, %v20_v29 }
  0x78   :  { %vm36_vm5 = vmor %vm24_vm1, %vm34_vm0 }
  0x79   :  { %vm48_vm8 = vmor %vm36_vm5, %vm46_vm4 }
  0x7e   :  { %v33_v33 = vpop.permute.xlu1 %32  ;;  %v23_v34 = vpop.permute.xlu0 %22 }
  0x7f   :  { %vm35_vm2 = vcmp.eq.s32.totalorder %v13_v32, %v33_v33  ;;  %vm25_vm3 = vcmp.eq.s32.totalorder %v13_v32, %v23_v34 }
  0x80   :  { %vm37_vm7 = vmor %vm25_vm3, %vm35_vm2 }
  0x81   :  { %vm49_vm9 = vmor %vm37_vm7, %vm47_vm6 }
  0x87   :  { %v55_v36 = vpop.permute.xlu1 %54  ;;  %v52_v37 = vpop.permute.xlu0 %51 }
  0x88   :  { %vm57_vm10 = vcmp.eq.s32.totalorder %v13_v32, %v55_v36  ;;  %vm56_vm11 = vcmp.eq.s32.totalorder %v13_v32, %v52_v37 }
  0x89   :  { %vm59_vm12 = vmor %vm49_vm9, %vm57_vm10 }
  0x8a   :  { %vm58_vm13 = vmor %vm48_vm8, %vm56_vm11  ;;  %127 = vmatmul.msk.f32.vlgmr.msra.gmra.mxu1 %vm59_vm12, %v187_v38 }
  0x8b   :  { %126 = vmatmul.msk.f32.vlgmr.msra.gmra.mxu0 %vm58_vm13, %v187_v38 }
 0x107   :  { %v100_v39 = vpop.f32.mrf.mxu1 }
 0x108   :  { %v97_v40 = vpop.f32.mrf.mxu0  ;;  %105 = vst.msk [vmem:[#allocation2 + $0x8] sm:$0xff] %vm103_vm14, %v100_v39 }
 0x109   :  { %104 = vst.msk [vmem:[#allocation2] sm:$0xff] %vm103_vm14, %v97_v40 }
 0x10a   :  { %118 = dma.vmem_to_hbm [thread:$0]  %s111_s16, 256, %s113_s19, [#allocation3], %s189_s20, %s189_s20, %s190_s21  }
 0x10b   :  { %181 = dma.done.wait [#allocation3], 256  }
 0x10c   :  { %182 = vsyncadd [#allocation3], 4294967040 }
 0x10d   :  { %123 = vsyncpa [#allocation3], 1 }

</bundles_post_ra>
